<compile_context>
chip_gen: v5e
topology: v5e:2x2
jax: 0.10.0
libtpu: 0.0.40
codegen_flags: <defaults>
</compile_context>

<pallas_src>
import jax
import jax.numpy as jnp
from jax.experimental import pallas as pl
from jax.experimental.pallas import tpu as pltpu


def _round_up(a: int, b: int) -> int:
    return ((a + b - 1) // b) * b


def _linear_kernel(x_ref, w_ref, o_ref):
    # (TM/P, P*d_inp) @ (P*d_inp, P*d_model) -> (TM/P, P*d_model), f32 accumulate.
    o_ref[...] = jnp.dot(
        x_ref[...], w_ref[...], preferred_element_type=jnp.float32
    ).astype(o_ref.dtype)


def pack_weight(weight, dtype=None):
    """One-time weight prep (call at module init, outside the hot path).

    weight: (d_model, d_inp), PyTorch nn.Linear layout.
    Returns (w_packed, p): w_packed has shape (p*d_inp, p*d_model) where p is
    the number of logical output rows packed into one 128-lane output row.
    """
    d_model, d_inp = weight.shape
    dtype = dtype if dtype is not None else weight.dtype
    if d_model % 128 == 0:
        p = 1                      # already lane-dense
    elif 128 % d_model == 0:
        p = 128 // d_model         # pack p rows -> 128 lanes
    else:
        p = 1                      # fallback: correct, but lane-masked stores
    w_t = weight.T.astype(dtype)   # (d_inp, d_model)
    if p > 1:
        # Block-diagonal: kron(I_p, W^T), shape (p*d_inp, p*d_model == 128).
        w_packed = jnp.kron(jnp.eye(p, dtype=dtype), w_t)
    else:
        w_packed = w_t
    return w_packed, p


def time_feature_embedding_packed(x, w_packed, p):
    """x: (B, L, d_inp); w_packed: (p*d_inp, p*d_model). Returns (B, L, d_model)."""
    B, L, d_inp = x.shape
    assert w_packed.shape[0] == p * d_inp
    d_model = w_packed.shape[1] // p
    M = B * L
    dtype = x.dtype
    itemsize = jnp.dtype(dtype).itemsize

    # Block-row budget: ~2 MiB of output per block (so double-buffered VMEM
    # stays ~4-5 MiB) -> safe on v5e/v6e/v7x default scoped-VMEM limits while
    # large enough to amortize per-step overhead of this HBM-bound stream.
    tm = (2 * 1024 * 1024) // max(1, d_model * itemsize)
    tm = max(1024, min(32768, tm))
    align = max(8 * p, 128)                  # keeps TM//p a multiple of 8
    tm = min(tm, _round_up(M, align))
    tm = _round_up(tm, align)

    m_pad = _round_up(M, tm)
    grid = m_pad // tm
    rows_per_block = tm // p

    x2d = x.reshape(M, d_inp)
    if m_pad != M:
        # Zero-pad so every grid block is full; padded rows are sliced off below.
        x2d = jnp.pad(x2d, ((0, m_pad - M), (0, 0)))
    # Free row-major reinterpretation: xv[r, q*d_inp + k] == x2d[p*r + q, k].
    xv = x2d.reshape(m_pad // p, p * d_inp)

    out_flat = pl.pallas_call(
        _linear_kernel,
        out_shape=jax.ShapeDtypeStruct((m_pad // p, p * d_model), dtype),
        grid_spec=pltpu.PrefetchScalarGridSpec(
            num_scalar_prefetch=0,
            grid=(grid,),
            in_specs=[
                # Streamed activations, one row-block per grid step.
                # (If profiling ever shows exposed DMA, this is where to add
                #  pipeline_mode=pl.Buffered(3).)
                pl.BlockSpec((rows_per_block, p * d_inp), lambda i: (i, 0)),
                # Packed weight: constant index_map -> VMEM-resident.
                pl.BlockSpec((p * d_inp, p * d_model), lambda i: (0, 0)),
            ],
            out_specs=pl.BlockSpec((rows_per_block, p * d_model), lambda i: (i, 0)),
        ),
        compiler_params=pltpu.CompilerParams(
            # No cross-iteration carry -> parallel (sharded across 2 TCs on v7x).
            dimension_semantics=("parallel",),
        ),
    )(xv, w_packed)

    # Free reinterpretation back to (M_pad, d_model), drop padded rows.
    out2d = out_flat.reshape(m_pad, d_model)[:M]
    return out2d.reshape(B, L, d_model)


def time_feature_embedding(x, weight):
    """Drop-in wrapper (packs the weight per call). Prefer pack_weight(...)
    once at init + time_feature_embedding_packed(...) in the hot path."""
    w_packed, p = pack_weight(weight, dtype=x.dtype)
    return time_feature_embedding_packed(x, w_packed, p)


if __name__ == "__main__":
    # freq='h' -> d_inp = 4; small d_model for the smoke test.
    d_inp = 4
    d_model = 32
    B, L = 2, 8

    key = jax.random.PRNGKey(0)
    kx, kw = jax.random.split(key)

    x = jax.random.normal(kx, (B, L, d_inp), dtype=jnp.float32)
    # deterministic init mimicking nn.Linear's uniform(-1/sqrt(d_inp), 1/sqrt(d_inp))
    bound = 1.0 / (d_inp ** 0.5)
    weight = jax.random.uniform(
        kw, (d_model, d_inp), minval=-bound, maxval=bound, dtype=jnp.float32
    )

    # Recommended usage: pack the weight once (module init), reuse every call.
    w_packed, p = pack_weight(weight)
    out = time_feature_embedding_packed(x, w_packed, p)
    out = jax.block_until_ready(out)

    # sanity check against plain-JAX reference
    ref = jnp.einsum("bld,md->blm", x, weight)
    assert out.shape == (B, L, d_model)
    assert jnp.allclose(out, ref, atol=1e-5, rtol=1e-5), float(
        jnp.max(jnp.abs(out - ref))
    )

    print("KERNEL_OK")
</pallas_src>

<mosaic_0001>
module attributes {stable_mosaic.version = 11 : i64} {
  func.func @_linear_kernel(%arg0: i32, %arg1: memref<32x16xf32, #tpu.memory_space<vmem>>, %arg2: memref<16x128xf32, #tpu.memory_space<vmem>>, %arg3: memref<32x128xf32, #tpu.memory_space<vmem>>) attributes {dimension_semantics = [#tpu.dimension_semantics<parallel>], iteration_bounds = array<i64: 1>, scalar_prefetch = 0 : i64, scratch_operands = 0 : i64, tpu.core_type = #tpu.core_type<tc>, window_params = [{transform_indices = @transform_0, window_bounds = array<i64: 32, 16>}, {pipeline_mode = #tpu.pipeline_mode<synchronous>, transform_indices = @transform_1, window_bounds = array<i64: 16, 128>}, {transform_indices = @transform_2, window_bounds = array<i64: 32, 128>}]} {
    %c0 = arith.constant 0 : index
    %c0_0 = arith.constant 0 : index
    %0 = vector.load %arg1[%c0, %c0_0] : memref<32x16xf32, #tpu.memory_space<vmem>>, vector<32x16xf32>
    %c0_1 = arith.constant 0 : index
    %c0_2 = arith.constant 0 : index
    %1 = vector.load %arg2[%c0_1, %c0_2] : memref<16x128xf32, #tpu.memory_space<vmem>>, vector<16x128xf32>
    %cst = arith.constant dense<0.000000e+00> : vector<32x128xf32>
    %2 = tpu.matmul %0, %1, %cst {dimension_numbers = #tpu.dot_dimension_numbers<[1], [0], [0], [1], [0, 0, 1, 1], [], []>} : vector<32x16xf32>, vector<16x128xf32>, vector<32x128xf32> -> vector<32x128xf32>
    %c0_3 = arith.constant 0 : index
    %c0_4 = arith.constant 0 : index
    %3 = vector.load %arg3[%c0_3, %c0_4] : memref<32x128xf32, #tpu.memory_space<vmem>>, vector<32x128xf32>
    tpu.vector_store %arg3[%c0_3, %c0_4], %2 {strides = array<i32>} : memref<32x128xf32, #tpu.memory_space<vmem>>, vector<32x128xf32>,
    return
  }
  func.func @transform_0(%arg0: i32) -> (i32, i32) {
    %c0_i32 = arith.constant 0 : i32
    %c0_i32_0 = arith.constant 0 : i32
    return %arg0, %c0_i32 : i32, i32
  }
  func.func @transform_1(%arg0: i32) -> (i32, i32) {
    %c0_i32 = arith.constant 0 : i32
    %c0_i32_0 = arith.constant 0 : i32
    %c0_i32_1 = arith.constant 0 : i32
    return %c0_i32, %c0_i32_0 : i32, i32
  }
  func.func @transform_2(%arg0: i32) -> (i32, i32) {
    %c0_i32 = arith.constant 0 : i32
    %c0_i32_0 = arith.constant 0 : i32
    return %arg0, %c0_i32 : i32, i32
  }
}

</mosaic_0001>

<bundles_post_ra>
// kernel: tpu_custom_call.1
= control target key start
LH: loop header
LB: loop body
LE: loop exit
PB: predicated region body
PF: predicated region fallthrough
CT: control target
= control target key end

     0   :  { %vm18_vm0 = vcmask 130048   ;;  %s160_s0 = inlined_call_operand.vmem [shape: f32[32,16], index: 0, kind: input, shape index: {}]   ;;  %s161_s1 = inlined_call_operand.vmem [shape: f32[16,128], index: 1, kind: input, shape index: {}]   ;;  %s162_s2 = inlined_call_operand.hbm [shape: f32[32,128], index: 2, kind: output, shape index: {}]  }
   0x1   :  { %v17_v0 = vld [vmem:[%s161_s1 + $0x8] sm:$0xff]  ;;  %v16_v1 = vld [vmem:[%s161_s1] sm:$0xff]  ;;  %v14_v2 = vld [vmem:[%s160_s0 + $0x10] sm:$0xff] }
   0x2   :  { %87 = vmatpush.msra.mxu2 %v17_v0  ;;  %88 = vmatpush.msra.mxu3 %v17_v0  ;;  %v15_v3 = vld [vmem:[%s160_s0 + $0x18] sm:$0xff] }
   0x3   :  { %45 = vmatpush.msra.mxu0 %v17_v0  ;;  %86 = vmatpush.msra.mxu1 %v17_v0 }
   0x4   :  { %7 = vsyncpa [#allocation3], 0  ;;  %90 = vmatpush.msra.mxu2 %v16_v1  ;;  %91 = vmatpush.msra.mxu3 %v16_v1  ;;  %v12_v4 = vld [vmem:[%s160_s0] sm:$0xff]  ;;  %v13_v5 = vld [vmem:[%s160_s0 + $0x8] sm:$0xff]  ;;  %s121_s20 = smov [#allocation2]   ;;  %s70_s24 = sshll.u32 %s162_s2, 4  ;;  %s71_s24 = int_to_ptr.hbm [resolvable:$true] %s70_s24 }
   0x5   :  { %84 = vmatmul.msk.f32.vlgmr.msra.gmra.mxu2 %vm18_vm0, %v14_v2  ;;  %85 = vmatmul.msk.f32.vlgmr.msra.gmra.mxu3 %vm18_vm0, %v15_v3  ;;  %s68_s21 = sshll.u32 %s121_s20, 4  ;;  %s122_s0 = smov 128   ;;  %s69_s21 = int_to_ptr.vmem [resolvable:$true] %s68_s21 }
   0x6   :  { %46 = vmatpush.msra.mxu0 %v16_v1  ;;  %89 = vmatpush.msra.mxu1 %v16_v1  ;;  %s123_s25 = smov 8  }
   0x7   :  { %82 = vmatmul.msk.f32.vlgmr.msra.gmra.mxu0 %vm18_vm0, %v12_v4  ;;  %83 = vmatmul.msk.f32.vlgmr.msra.gmra.mxu1 %vm18_vm0, %v13_v5 }
  0x84   :  { %v48_v6 = vpop.f32.mrf.mxu0  ;;  %v51_v7 = vpop.f32.mrf.mxu1 }
  0x85   :  { %60 = vst [vmem:[#allocation2] sm:$0xff] %v48_v6 }
  0x86   :  { %61 = vst [vmem:[#allocation2 + $0x8] sm:$0xff] %v51_v7 }
  0x88   :  { %v54_v8 = vpop.f32.mrf.mxu2  ;;  %v57_v9 = vpop.f32.mrf.mxu3 }
  0x89   :  { %62 = vst [vmem:[#allocation2 + $0x10] sm:$0xff] %v54_v8 }
  0x8a   :  { %63 = vst [vmem:[#allocation2 + $0x18] sm:$0xff] %v57_v9 }
  0x8b   :  { %76 = dma.vmem_to_hbm [thread:$0]  %s69_s21, 512, %s71_s24, [#allocation3], %s122_s0, %s122_s0, %s123_s25  }
  0x8c   :  { %119 = dma.done.wait [#allocation3], 512  }
  0x8d   :  { %120 = vsyncadd [#allocation3], 4294966784 }
  0x8e   :  { %81 = vsyncpa [#allocation3], 1 }

</bundles_post_ra>
